<compile_context>
chip_gen: v5e
topology: v5e:2x2
jax: 0.10.0
libtpu: 0.0.40
codegen_flags: <defaults>
</compile_context>

<pallas_src>
import jax
import jax.numpy as jnp
from jax.experimental import pallas as pl
from jax.experimental.pallas import tpu as pltpu


def _round_up(x, m):
    return ((x + m - 1) // m) * m


def _vmem_capacity_bytes():
    """Per-TensorCore VMEM capacity; conservative default if the query fails."""
    try:
        return int(pltpu.get_tpu_info().vmem_capacity_bytes)
    except Exception:
        return 64 << 20  # v7x per-TC size -- the smallest of the three gens.


def gcn_kernel(adj_ref, x_ref, w_ref, b_ref, o_ref, acc_ref):
    # Re-associated GCN step: out_tile = (sum_k adj_tile @ x_tile) @ W + b
    #   adj_ref: (TM, TK)        x_ref: (TK, F_in)
    #   w_ref:   (F_in, F_out_p) b_ref: (1, F_out_p)
    #   o_ref:   (TM, F_out_p)   acc_ref: (TM, F_in) f32 scratch
    k = pl.program_id(2)

    @pl.when(k == 0)
    def _init():
        acc_ref[...] = jnp.zeros_like(acc_ref)

    # Main HBM-bound contraction over the node dim, accumulated in f32.
    # Kept as a single fused `+= dot` so v7x's MRB in-place accumulate applies.
    acc_ref[...] += jnp.dot(adj_ref[...], x_ref[...],
                            preferred_element_type=jnp.float32)

    @pl.when(k == pl.num_programs(2) - 1)
    def _epilogue():
        # One skinny matmul per output tile (instead of one per k step),
        # bias folded in, single lane-dense store.
        agg = acc_ref[...].astype(w_ref.dtype)
        out = jnp.dot(agg, w_ref[...], preferred_element_type=jnp.float32)
        out = out + b_ref[...].astype(jnp.float32)
        o_ref[...] = out.astype(o_ref.dtype)


def gcn_layer(x, adj, weight, bias, *, compute_dtype=jnp.bfloat16):
    """out = adj @ (x @ weight) + bias, matching the PyTorch GCNLayer forward.

    compute_dtype controls the dtype of the DMA / MXU-operand streams
    (adj, x, W).  Accumulation is always f32; output keeps x's dtype.
    """
    B, N, F_in = x.shape
    F_out = weight.shape[1]
    out_dtype = x.dtype

    # Lane-dense output: pad F_out up to a multiple of 128.
    F_out_p = max(128, _round_up(F_out, 128))
    if F_out_p != F_out:
        weight = jnp.pad(weight, ((0, 0), (0, F_out_p - F_out)))
        bias = jnp.pad(bias, (0, F_out_p - F_out))
    bias2d = bias.reshape(1, F_out_p).astype(jnp.float32)

    if compute_dtype is None:
        compute_dtype = jnp.float32
    x = x.astype(compute_dtype)
    adj = adj.astype(compute_dtype)
    weight = weight.astype(compute_dtype)

    in_bytes = jnp.dtype(compute_dtype).itemsize
    out_bytes = jnp.dtype(out_dtype).itemsize

    # ---- Tile selection, gated by a per-generation VMEM budget. ----
    vmem_cap = _vmem_capacity_bytes()
    # ~48 MiB live budget on v7x (64 MiB/TC); up to ~96 MiB on v5e/v6e (128 MiB).
    vmem_budget = min(vmem_cap * 3 // 4, 96 << 20)

    TM = min(1024, _round_up(N, 8))     # output-row / adj-sublane tile
    TK = min(2048, _round_up(N, 128))   # contraction / adj-lane tile

    def live_bytes(tm, tk):
        return (3 * tm * tk * in_bytes                       # adj tiles (<=3 bufs)
                + 2 * tk * F_in * in_bytes                    # x tiles
                + 2 * tm * F_out_p * out_bytes                # out tiles
                + 2 * (F_in * F_out_p + F_out_p) * in_bytes   # weight + bias
                + tm * F_in * 4)                              # f32 accumulator

    while live_bytes(TM, TK) > vmem_budget and TK > 256:
        TK = _round_up(TK // 2, 128)
    while live_bytes(TM, TK) > vmem_budget and TM > 256:
        TM = _round_up(TM // 2, 8)
    # Megacore: keep >= 2 "parallel" (batch x row-tile) blocks for v7x's 2 TCs.
    while B * (-(-N // TM)) < 2 and TM > 256:
        TM = _round_up(TM // 2, 8)

    # Pad the node dim so the grid divides exactly.  Zero-padded adj rows/cols
    # and zero-padded x rows contribute nothing; padded output rows are sliced.
    N_rows = _round_up(N, TM)
    N_cols = _round_up(N, TK)
    if N_rows != N or N_cols != N:
        adj = jnp.pad(adj, ((0, 0), (0, N_rows - N), (0, N_cols - N)))
        x = jnp.pad(x, ((0, 0), (0, N_cols - N), (0, 0)))

    grid = (B, N_rows // TM, N_cols // TK)
    total_steps = grid[0] * grid[1] * grid[2]
    # 3-deep pipeline on the only large stream (adj) once the grid is long
    # enough for it to matter; default double-buffering otherwise.
    adj_pipeline = pl.Buffered(3) if total_steps >= 4 else None

    vmem_limit = int(max(32 << 20,
                         min(vmem_budget, live_bytes(TM, TK) + (8 << 20))))

    cost = pl.CostEstimate(
        flops=(2 * B * N_rows * N_cols * F_in          # adj @ x
               + 2 * B * N_rows * F_in * F_out_p),     # (adj @ x) @ W epilogue
        transcendentals=0,
        bytes_accessed=(B * N_rows * N_cols * in_bytes                   # adj
                        + B * N_cols * F_in * in_bytes * (N_rows // TM)  # x re-reads
                        + F_in * F_out_p * in_bytes                      # weight
                        + B * N_rows * F_out_p * out_bytes),             # output
    )

    out = pl.pallas_call(
        gcn_kernel,
        out_shape=jax.ShapeDtypeStruct((B, N_rows, F_out_p), out_dtype),
        grid_spec=pltpu.PrefetchScalarGridSpec(
            num_scalar_prefetch=0,
            grid=grid,
            in_specs=[
                # Adjacency tile: the bandwidth-dominant stream.
                pl.BlockSpec((None, TM, TK), lambda b, i, k: (b, i, k),
                             pipeline_mode=adj_pipeline),
                # x k-slice of nodes.
                pl.BlockSpec((None, TK, F_in), lambda b, i, k: (b, k, 0)),
                # Weight / bias: constant block index -> fetched once, resident.
                pl.BlockSpec((F_in, F_out_p), lambda b, i, k: (0, 0)),
                pl.BlockSpec((1, F_out_p), lambda b, i, k: (0, 0)),
            ],
            out_specs=pl.BlockSpec((None, TM, F_out_p),
                                   lambda b, i, k: (b, i, 0)),
            scratch_shapes=[pltpu.VMEM((TM, F_in), jnp.float32)],
        ),
        compiler_params=pltpu.CompilerParams(
            dimension_semantics=("parallel", "parallel", "arbitrary"),
            vmem_limit_bytes=vmem_limit,
        ),
        cost_estimate=cost,
    )(adj, x, weight, bias2d)

    return out[:, :N, :F_out]


def gcn_reference(x, adj, weight, bias):
    support = jnp.matmul(x, weight, precision="highest")
    out = jnp.matmul(adj, support, precision="highest")
    return out + bias


if __name__ == "__main__":
    key = jax.random.PRNGKey(0)
    k_x, k_adj, k_w = jax.random.split(key, 3)

    B, N = 2, 16          # batch of graphs, nodes per graph
    F_in, F_out = 8, 32   # in_features, out_features

    # Deterministic "xavier_uniform_" init for the weight, zeros for bias.
    bound = (6.0 / (F_in + F_out)) ** 0.5
    weight = jax.random.uniform(k_w, (F_in, F_out), jnp.float32, -bound, bound)
    bias = jnp.zeros((F_out,), jnp.float32)

    # Inputs: node features and a dense, row-normalized adjacency.
    x = jax.random.normal(k_x, (B, N, F_in), jnp.float32)
    adj_raw = jax.random.uniform(k_adj, (B, N, N), jnp.float32)
    adj = adj_raw / jnp.sum(adj_raw, axis=-1, keepdims=True)

    ref = gcn_reference(x, adj, weight, bias)

    # Default path: bf16 adj/x/W streams, f32 accumulation, f32 output.
    out = jax.block_until_ready(gcn_layer(x, adj, weight, bias))
    assert out.shape == (B, N, F_out)
    assert out.dtype == x.dtype
    assert jnp.allclose(out, ref, atol=5e-2, rtol=5e-2)

    # f32 validation mode: tracks the f32 reference tightly.
    out_f32 = jax.block_until_ready(
        gcn_layer(x, adj, weight, bias, compute_dtype=jnp.float32))
    assert jnp.allclose(out_f32, ref, atol=1e-4, rtol=1e-4)

    print("KERNEL_OK")
</pallas_src>

<mosaic_0001>
module attributes {stable_mosaic.version = 11 : i64} {
  func.func @gcn_kernel(%arg0: i32, %arg1: i32, %arg2: i32, %arg3: memref<1x16x128xbf16, #tpu.memory_space<vmem>>, %arg4: memref<1x128x8xbf16, #tpu.memory_space<vmem>>, %arg5: memref<8x128xbf16, #tpu.memory_space<vmem>>, %arg6: memref<1x128xf32, #tpu.memory_space<vmem>>, %arg7: memref<1x16x128xf32, #tpu.memory_space<vmem>>, %arg8: memref<16x8xf32, #tpu.memory_space<vmem>>) attributes {dimension_semantics = [#tpu.dimension_semantics<parallel>, #tpu.dimension_semantics<parallel>, #tpu.dimension_semantics<arbitrary>], iteration_bounds = array<i64: 2, 1, 1>, scalar_prefetch = 0 : i64, scratch_operands = 1 : i64, tpu.core_type = #tpu.core_type<tc>, window_params = [{transform_indices = @transform_0, window_bounds = array<i64: 1, 16, 128>}, {transform_indices = @transform_1, window_bounds = array<i64: 1, 128, 8>}, {pipeline_mode = #tpu.pipeline_mode<synchronous>, transform_indices = @transform_2, window_bounds = array<i64: 8, 128>}, {pipeline_mode = #tpu.pipeline_mode<synchronous>, transform_indices = @transform_3, window_bounds = array<i64: 1, 128>}, {transform_indices = @transform_4, window_bounds = array<i64: 1, 16, 128>}]} {
    %c0_i32 = arith.constant 0 : i32
    %0 = arith.cmpi eq, %arg2, %c0_i32 : i32
    %1 = arith.extui %0 : i1 to i32
    %c0_i32_0 = arith.constant 0 : i32
    %2 = arith.cmpi ne, %1, %c0_i32_0 : i32
    scf.if %2 {
      %cst_12 = arith.constant 0.000000e+00 : f32
      %14 = vector.broadcast %cst_12 : f32 to vector<16x8xf32>
      %c0_13 = arith.constant 0 : index
      %c0_14 = arith.constant 0 : index
      %15 = vector.load %arg8[%c0_13, %c0_14] : memref<16x8xf32, #tpu.memory_space<vmem>>, vector<16x8xf32>
      tpu.vector_store %arg8[%c0_13, %c0_14], %14 {strides = array<i32>} : memref<16x8xf32, #tpu.memory_space<vmem>>, vector<16x8xf32>,
    } else {
    }
    %c0 = arith.constant 0 : index
    %c0_1 = arith.constant 0 : index
    %3 = vector.load %arg8[%c0, %c0_1] : memref<16x8xf32, #tpu.memory_space<vmem>>, vector<16x8xf32>
    %c0_2 = arith.constant 0 : index
    %c0_3 = arith.constant 0 : index
    %c0_4 = arith.constant 0 : index
    %4 = vector.load %arg3[%c0_2, %c0_3, %c0_4] : memref<1x16x128xbf16, #tpu.memory_space<vmem>>, vector<1x16x128xbf16>
    %5 = vector.shape_cast %4 : vector<1x16x128xbf16> to vector<16x128xbf16>
    %c0_5 = arith.constant 0 : index
    %c0_6 = arith.constant 0 : index
    %c0_7 = arith.constant 0 : index
    %6 = vector.load %arg4[%c0_5, %c0_6, %c0_7] : memref<1x128x8xbf16, #tpu.memory_space<vmem>>, vector<1x128x8xbf16>
    %7 = vector.shape_cast %6 : vector<1x128x8xbf16> to vector<128x8xbf16>
    %cst = arith.constant dense<0.000000e+00> : vector<16x8xf32>
    %8 = tpu.matmul %5, %7, %cst {dimension_numbers = #tpu.dot_dimension_numbers<[1], [0], [0], [1], [0, 0, 1, 1], [], []>} : vector<16x128xbf16>, vector<128x8xbf16>, vector<16x8xf32> -> vector<16x8xf32>
    %9 = arith.addf %3, %8 : vector<16x8xf32>
    %c0_8 = arith.constant 0 : index
    %c0_9 = arith.constant 0 : index
    %10 = vector.load %arg8[%c0_8, %c0_9] : memref<16x8xf32, #tpu.memory_space<vmem>>, vector<16x8xf32>
    tpu.vector_store %arg8[%c0_8, %c0_9], %9 {strides = array<i32>} : memref<16x8xf32, #tpu.memory_space<vmem>>, vector<16x8xf32>,
    %c0_i32_10 = arith.constant 0 : i32
    %11 = arith.cmpi eq, %arg2, %c0_i32_10 : i32
    %12 = arith.extui %11 : i1 to i32
    %c0_i32_11 = arith.constant 0 : i32
    %13 = arith.cmpi ne, %12, %c0_i32_11 : i32
    scf.if %13 {
      %c0_12 = arith.constant 0 : index
      %c0_13 = arith.constant 0 : index
      %14 = vector.load %arg8[%c0_12, %c0_13] : memref<16x8xf32, #tpu.memory_space<vmem>>, vector<16x8xf32>
      %15 = arith.truncf %14 : vector<16x8xf32> to vector<16x8xbf16>
      %c0_14 = arith.constant 0 : index
      %c0_15 = arith.constant 0 : index
      %16 = vector.load %arg5[%c0_14, %c0_15] : memref<8x128xbf16, #tpu.memory_space<vmem>>, vector<8x128xbf16>
      %cst_16 = arith.constant dense<0.000000e+00> : vector<16x128xf32>
      %17 = tpu.matmul %15, %16, %cst_16 {dimension_numbers = #tpu.dot_dimension_numbers<[1], [0], [0], [1], [0, 0, 1, 1], [], []>} : vector<16x8xbf16>, vector<8x128xbf16>, vector<16x128xf32> -> vector<16x128xf32>
      %c0_17 = arith.constant 0 : index
      %c0_18 = arith.constant 0 : index
      %18 = vector.load %arg6[%c0_17, %c0_18] : memref<1x128xf32, #tpu.memory_space<vmem>>, vector<1x128xf32>
      %19 = vector.broadcast %18 : vector<1x128xf32> to vector<16x128xf32>
      %20 = arith.addf %17, %19 : vector<16x128xf32>
      %c0_19 = arith.constant 0 : index
      %c0_20 = arith.constant 0 : index
      %c0_21 = arith.constant 0 : index
      %21 = vector.load %arg7[%c0_19, %c0_20, %c0_21] : memref<1x16x128xf32, #tpu.memory_space<vmem>>, vector<1x16x128xf32>
      %22 = vector.shape_cast %21 : vector<1x16x128xf32> to vector<16x128xf32>
      %23 = vector.shape_cast %20 : vector<16x128xf32> to vector<1x16x128xf32>
      tpu.vector_store %arg7[%c0_19, %c0_20, %c0_21], %23 {strides = array<i32>} : memref<1x16x128xf32, #tpu.memory_space<vmem>>, vector<1x16x128xf32>,
    } else {
    }
    return
  }
  func.func @transform_0(%arg0: i32, %arg1: i32, %arg2: i32) -> (i32, i32, i32) {
    %c0_i32 = arith.constant 0 : i32
    return %arg0, %arg1, %arg2 : i32, i32, i32
  }
  func.func @transform_1(%arg0: i32, %arg1: i32, %arg2: i32) -> (i32, i32, i32) {
    %c0_i32 = arith.constant 0 : i32
    %c0_i32_0 = arith.constant 0 : i32
    return %arg0, %arg2, %c0_i32 : i32, i32, i32
  }
  func.func @transform_2(%arg0: i32, %arg1: i32, %arg2: i32) -> (i32, i32) {
    %c0_i32 = arith.constant 0 : i32
    %c0_i32_0 = arith.constant 0 : i32
    %c0_i32_1 = arith.constant 0 : i32
    return %c0_i32, %c0_i32_0 : i32, i32
  }
  func.func @transform_3(%arg0: i32, %arg1: i32, %arg2: i32) -> (i32, i32) {
    %c0_i32 = arith.constant 0 : i32
    %c0_i32_0 = arith.constant 0 : i32
    %c0_i32_1 = arith.constant 0 : i32
    return %c0_i32, %c0_i32_0 : i32, i32
  }
  func.func @transform_4(%arg0: i32, %arg1: i32, %arg2: i32) -> (i32, i32, i32) {
    %c0_i32 = arith.constant 0 : i32
    %c0_i32_0 = arith.constant 0 : i32
    return %arg0, %arg1, %c0_i32 : i32, i32, i32
  }
}

</mosaic_0001>

<bundles_post_ra>
// kernel: tpu_custom_call.1
= control target key start
LH: loop header
LB: loop body
LE: loop exit
PB: predicated region body
PF: predicated region fallthrough
CT: control target
= control target key end

     0   :  { %9 = vsyncpa [#allocation4], 0  ;;  %s879_s0 = inlined_call_operand.vmem [shape: bf16[2,16,128], index: 0, kind: input, shape index: {}]   ;;  %s880_s1 = inlined_call_operand.vmem [shape: bf16[2,128,8], index: 1, kind: input, shape index: {}]   ;;  %s881_s2 = inlined_call_operand.vmem [shape: bf16[8,128], index: 2, kind: input, shape index: {}]   ;;  %s882_s3 = inlined_call_operand.vmem [shape: f32[1,128], index: 3, kind: input, shape index: {}]   ;;  %s883_s4 = inlined_call_operand.hbm [shape: f32[2,16,128], index: 4, kind: output, shape index: {}]  }
   0x1   :  { %11 = vsyncpa [#allocation4 + $0x1], 0  ;;  %s768_s15 = smov 0   ;;  %s770_s16 = smov 0  }
   0x2   :  { %s772_s17 = smov 0   ;;  %s774_s18 = smov 0  }
   0x3   :  { %s776_s19 = smov 0   ;;  %s778_s20 = smov 0  }
   0x4 LB: > { %s537_s21 = sadd.s32 4294967295, %s738_s20   ;;  %s538_s22 = sadd.s32 4294967294, %s738_s20   ;;  %s738_s20 = sphi %s778_s20, %s17_s20   ;;  %s734_s19 = sphi %s776_s19, %s890_s19   ;;  %s730_s18 = sphi %s774_s18, %s889_s18   ;;  %s726_s17 = sphi %s772_s17, %s888_s17   ;;  %s722_s16 = sphi %s770_s16, %s887_s16   ;;  %s718_s15 = sphi %s768_s15, %s886_s15  }
   0x5   : > { %s36_s23 = sadd.s32 1, %s734_s19  ;;  %s145_s24 = sadd.s32 1, %s726_s17 }
   0x6   : > { %p38_p0 = scmp.ge.s32.totalorder %s36_s23, 2  ;;  %p155_p1 = scmp.ne.s32.totalorder %s726_s17, %s722_s16 }
   0x7   : > { %p156_p2 = scmp.eq.s32.totalorder %s537_s21, 1  ;;  %p161_p3 = scmp.ne.s32.totalorder %s722_s16, %s718_s15 }
   0x8   : > { %s892_s23 = smov (%p38_p0, %s36_s23), 0  ;;  %p162_p5 = scmp.eq.s32.totalorder %s538_s22, 1 }
   0x9   : > { %p808_p4 = por %p156_p2, %p155_p1  ;;  %s140_s26 = ssub.s32 %s734_s19, %s892_s23 }
   0xa   : > { %p541_p6 = scmp.ge.s32.totalorder %s738_s20, 1  ;;  %p143_p7 = scmp.eq.s32.totalorder %s140_s26, 0 }
   0xb   : > { %p815_p8 = por %p162_p5, %p161_p3  ;;  %p215_p9 = scmp.lt.s32.totalorder %s738_s20, 3 }
   0xc   : > { %s821_s28 = scalar_select %p143_p7, %s726_s17, %s145_s24  }
   0xd   : > { %p216_p10 = pnand %p541_p6, %p215_p9 }
   0xe   : > { %p258_p11 = scmp.lt.s32.totalorder (!%p216_p10), %s730_s18, 1  ;;  %s254_s14 = sand.u32 (!%p216_p10), 1, %s722_s16  }
   0xf   : > { %219 = sbr.rel (%p216_p10) target bundleno = 342 (0x156), region = 36  ;;  %s542_s21 = sshll.u32 (!%p216_p10), %s254_s14, 4 }
  0x10   : > { %s600_s26 = sshll.u32 (!%p216_p10), %s730_s18, 4  ;;  %s256_s6 = scalar_lea.vmem (!%p216_p10), [#allocation3], %s542_s21 }
  0x11   : > { %s430_s5 = scalar_lea.hbm (!%p216_p10), %s883_s4, %s600_s26  ;;  %s417_s9 = scalar_lea.sflag (!%p216_p10), [#allocation4], %s254_s14 }
  0x12   : > { %s680_s13 = scalar_lea.hbm (!%p216_p10), %s883_s4, 32 }
  0x14   : > { %s259_s29 = scalar_select %p258_p11, %s730_s18, 1  ;;  %vm286_vm0 = vcmask 64512   ;;  %v740_v2 = vmov 0.0   ;;  %v388_v10 = vld [vmem:[%s881_s2] sm:$0xf]  ;;  %vm396_vm1 = vcmask 1043456  }
  0x15   : > { %287 = vst.msk [vmem:[#allocation2] sm:$0xff] %vm286_vm0, %v740_v2  ;;  %v398_v11 = vsel %vm396_vm1, %v388_v10, 0  ;;  %v659_v21 = vld [vmem:[%s882_s3] ss:$0 sm:$0xff] }
  0x16   : > { %s590_s30 = sshll.u32 %s259_s29, 6  ;;  %288 = vst.msk [vmem:[#allocation2 + $0x8] sm:$0xff] %vm286_vm0, %v740_v2  ;;  %s589_s8 = sshll.u32 %s259_s29, 3  ;;  %407 = vmatpush.bf16.msra.mxu1 %v398_v11 }
  0x17   : > { %s278_s7 = scalar_lea.vmem %s880_s1, %s590_s30  ;;  %s268_s11 = scalar_lea.vmem %s879_s0, %s589_s8 }
  0x18   : > { %v599_v0 = vld [vmem:[%s278_s7 + $0x38] sm:$0xff]  ;;  %v598_v1 = vld [vmem:[%s278_s7 + $0x30] sm:$0xff]  ;;  %v597_v3 = vld [vmem:[%s278_s7 + $0x28] sm:$0xff]  ;;  %s433_s8 = sshll.u32 %s430_s5, 4  ;;  %s434_s8 = int_to_ptr.hbm [resolvable:$true] %s433_s8 }
  0x19   : > { %363 = vmatpush.bf16.msra.mxu0 %v599_v0  ;;  %v596_v4 = vld [vmem:[%s278_s7 + $0x20] sm:$0xff]  ;;  %v595_v5 = vld [vmem:[%s278_s7 + $0x18] sm:$0xff]  ;;  %v594_v6 = vld [vmem:[%s278_s7 + $0x10] sm:$0xff]  ;;  %s674_s10 = sshra.s32 %s434_s8, 4  ;;  %s675_s10 = int_to_ptr.hbm [resolvable:$true] %s674_s10 }
  0x1a   : > { %v593_v7 = vld [vmem:[%s278_s7 + $0x8] sm:$0xff]  ;;  %v592_v8 = vld [vmem:[%s278_s7] sm:$0xff]  ;;  %s431_s7 = sshll.u32 %s256_s6, 4  ;;  %s676_s18 = scalar_lea.hbm %s675_s10, 16  ;;  %s432_s7 = int_to_ptr.vmem [resolvable:$true] %s431_s7 }
  0x1b   : > { %v591_v9 = vld [vmem:[%s268_s11] sm:$0xff]  ;;  %p677_p12 = scmp.ne.s32.totalorder %s675_s10, %s676_s18  ;;  %p681_p1 = scmp.lt.s32.totalorder %s675_s10, %s883_s4 }
  0x1c   : > { %v289_v12 = vld [vmem:[#allocation2] sm:$0xff]  ;;  %p682_p2 = scmp.lt.s32.totalorder %s680_s13, %s676_s18 }
  0x1d   : > { %364 = vmatpush.bf16.msra.mxu0 %v598_v1  ;;  %v290_v15 = vld [vmem:[#allocation2 + $0x8] sm:$0xff]  ;;  %p678_p13 = pnand %p677_p12, %p808_p4 }
  0x1e   : > { %p683_p3 = por %p682_p2, %p681_p1 }
  0x1f   : > { %p679_p0 = pneg %p678_p13 }
  0x21   : > { %365 = vmatpush.bf16.msra.mxu0 %v597_v3  ;;  %p684_p5 = pnand %p683_p3, %p679_p0 }
  0x25   : > { %366 = vmatpush.bf16.msra.mxu0 %v596_v4 }
  0x29   : > { %367 = vmatpush.bf16.msra.mxu0 %v595_v5 }
  0x2d   : > { %368 = vmatpush.bf16.msra.mxu0 %v594_v6 }
  0x31   : > { %369 = vmatpush.bf16.msra.mxu0 %v593_v7 }
  0x35   : > { %370 = vmatpush.bf16.msra.mxu0 %v592_v8 }
  0x38   : > { %371 = vmatmul.bf16.vlgmr.msra.gmra.mxu0 %v591_v9 }
  0xb5   : > { %v372_v13 = vpop.f32.mrf.mxu0 }
  0xb6   : > { %v377_v14 = vadd.f32 %v372_v13, %v289_v12 }
  0xb8   : > { %380 = vst.msk [vmem:[#allocation2] sm:$0xff] %vm286_vm0, %v377_v14 }
  0xbd   : > { %v374_v16 = vpop.f32.mrf.mxu0 }
  0xbe   : > { %v378_v17 = vadd.f32 %v374_v16, %v290_v15 }
  0xbf   : > { %v385_v18 = vld [vmem:[#allocation2] sm:$0xff] }
  0xc0   : > { %381 = vst.msk [vmem:[#allocation2 + $0x8] sm:$0xff] %vm286_vm0, %v378_v17 }
  0xc7   : > { %v386_v19 = vld [vmem:[#allocation2 + $0x8] sm:$0xff] }
  0xc8   : > { %v387_v20 = vpack.c.bf16 %v386_v19, %v385_v18 }
  0xca   : > { %583 = vmatmul.msk.bf16.vlgmr.msra.gmra.mxu1 %vm286_vm0, %v387_v20 }
 0x147   : > { %v409_v22 = vpop.f32.mrf.mxu1 }
 0x148   : > { %v410_v23 = vadd.f32 %v659_v21, %v409_v22 }
 0x14a   : > { %414 = vst [vmem:[%s256_s6] sm:$0xff] %v410_v23 }
 0x14f   : > { %v411_v24 = vpop.f32.mrf.mxu1 }
 0x150   : > { %v412_v25 = vadd.f32 %v659_v21, %v411_v24 }
 0x152   : > { %415 = vst [vmem:[%s256_s6 + $0x8] sm:$0xff] %v412_v25 }
 0x153   : > { %687 = shalt.err (!%p684_p5)
}
 0x154   : > { %s741_s14 = smov 128   ;;  %s742_s24 = smov 8  }
 0x155   : > { %601 = dma.vmem_to_hbm [thread:$0]  (%p808_p4), %s432_s7, 256, %s434_s8, %s417_s9, %s741_s14, %s741_s14, %s742_s24  }
 0x156 PF: > { %p607_p6 = scmp.ge.s32.totalorder %s738_s20, 2  ;;  %s448_s26 = sand.u32 1, %s718_s15  }
 0x157   : > { %s449_s29 = scalar_lea.sflag [#allocation4], %s448_s26 }
 0x158   : > { %p604_p7 = pnand %p607_p6, %p815_p8 }
 0x15a   : > { %p605_p9 = pneg %p604_p7 }
 0x15c   : > { %713 = dma.done.wait (%p605_p9), %s449_s29, 256  }
 0x15d   : > { %715 = vsyncadd (%p605_p9), %s449_s29, 4294967040  ;;  %s17_s20 = sadd.s32 1, %s738_s20   ;;  %s886_s15 = smov %s722_s16 }
 0x15e   : > { %p14_p10 = scmp.ge.s32.totalorder %s17_s20, 4   ;;  %s887_s16 = smov %s726_s17 }
 0x15f   : > { %s888_s17 = smov %s821_s28  ;;  %s889_s18 = smov %s734_s19 }
 0x160   : > { %s890_s19 = smov %s892_s23  ;;  %16 = sbr.rel (!%p14_p10) target bundleno = 4 (0x4), region = 82 }
 0x165   :  { %455 = vsyncpa [#allocation4], 1 }
 0x166   :  { %457 = vsyncpa [#allocation4 + $0x1], 1 }

</bundles_post_ra>
